<compile_context>
chip_gen: v7x
topology: tpu7x:2x2x1
jax: 0.10.0
libtpu: 0.0.40
codegen_flags: <defaults>
</compile_context>

<pallas_src>
import jax
import jax.numpy as jnp
from jax.experimental import pallas as pl
from jax.experimental.pallas import tpu as pltpu


# ----------------------------- kernel ---------------------------------------


def _watershed_masks_kernel(lab_ref, img_ref, out_ref):
    """One grid step: (1, Lt) seed labels + (Bt, 1, Lt) image -> (Bt, M, Lt) bool."""
    M = out_ref.shape[1]                                   # == G0 * G1 + 1
    img = img_ref[:, 0, :].astype(jnp.float32)             # (Bt, Lt)

    # uint8-quantization foreground surrogate: trunc(img * 255) != 0  <=>
    # |img| * 255 >= 1.  Single compare, no f32->i32 convert per pixel.
    fg = jnp.abs(img) * 255.0 >= 1.0                       # (Bt, Lt) bool
    labels = jnp.where(fg, lab_ref[...], 0)                # (Bt, Lt) int32 (lab broadcasts)

    # convert_idx_masks_to_bool: channel m <- (labels == m), m = 0..M-1.
    # This broadcast compare IS the output; bool is written directly (lane-dense).
    m_ids = jax.lax.broadcasted_iota(jnp.int32, (M, 1), 0)
    out_ref[...] = labels[:, None, :] == m_ids[None, :, :]


# ----------------------------- tiling ---------------------------------------

_LANE_TILE_MAX = 32768          # lanes per block (multiple of 128)
_TARGET_OUT_BYTES = 4 << 20     # ~4 MiB logical bool output per grid step
_VMEM_CAP_BYTES = 48 << 20      # safe on v7x (64 MiB physical VMEM); fine on v5e/v6e


def _round_up(a, b):
    return -(-a // b) * b


def _largest_divisor_at_most(n, cap):
    d = max(1, min(n, cap))
    while n % d:
        d -= 1
    return d


def _vmem_needed(bt, lt, M):
    out_pad = bt * _round_up(M, 32) * lt     # bool/int8 tile = (32, 128): 65 -> 96 sublanes
    in_pad = bt * 32 * lt                    # (1, lt) last-two dims pad to a full sublane tile
    lab_pad = 8 * lt * 4                     # (1, lt) int32 row pads to 8 sublanes
    tmp = 4 * bt * M * lt                    # generous budget for compare temporaries
    return 2 * (out_pad + in_pad + lab_pad) + tmp + (8 << 20)


def _pick_tiles(N, HW, M):
    # Fixed 128-multiple lane tile with a cdiv grid (ragged last block is masked),
    # so any H*W factorization gets uniform, DMA-friendly blocks.
    lt = HW if HW <= _LANE_TILE_MAX else _LANE_TILE_MAX
    bt = _largest_divisor_at_most(N, max(1, _TARGET_OUT_BYTES // (M * lt)))

    def shrink(bt, lt):
        if bt > 1:
            return _largest_divisor_at_most(N, bt // 2), lt
        return bt, max(128, _round_up(-(-lt // 2), 128))

    # Explicit (padded, double-buffered) VMEM accounting; shrink until it fits.
    while _vmem_needed(bt, lt, M) > _VMEM_CAP_BYTES and (bt > 1 or lt > 128):
        bt, lt = shrink(bt, lt)

    # v7x megacore: keep >= 2 grid steps along the "parallel" axes so the second
    # TensorCore is not idle (harmless on single-TC v5e/v6e).
    if (N // bt) * pl.cdiv(HW, lt) < 2 and (bt > 1 or lt > 128):
        bt, lt = shrink(bt, lt)

    return bt, lt


# ----------------------------- wrapper ---------------------------------------


def mass_maps_watershed(images, *, compactness=0, normalize=False, seed_grid=(8, 8)):
    """JAX/Pallas equivalent of MassMapsWatershed(compactness, normalize).forward."""
    del compactness  # TODO(synk): compactness only affects the true priority-flood watershed; unused by the surrogate.
    N, C, H, W = images.shape
    assert C == 1, "MassMapsWatershed expects single-channel images (N, 1, H, W)"
    G0, G1 = seed_grid
    M = G0 * G1 + 1
    HW = H * W

    if normalize:
        mn = images.min(axis=(1, 2, 3), keepdims=True)
        mx = images.max(axis=(1, 2, 3), keepdims=True)
        scale = 1.0 / jnp.maximum(mx - mn, jnp.asarray(1e-12, images.dtype))
        images = (images - mn) * scale
        # TODO(synk): fold per-image (offset, threshold) scalars into the kernel to
        # avoid materializing this normalized copy (extra ~8 B/px of HBM traffic).

    # Lane-dense pixel slab in the ORIGINAL dtype; cast to f32 per block in VMEM.
    x = images.reshape(N, 1, HW)

    # Seed-cell label row (depends only on pixel coordinates) hoisted out of the
    # kernel: the integer divides run once, not once per (batch, pixel) block.
    p = jnp.arange(HW, dtype=jnp.int32)
    yy = p // W
    xx = p - yy * W
    cell = ((yy * G0) // H) * G1 + ((xx * G1) // W)        # in [0, G0*G1)
    lab = (cell + 1).reshape(1, HW).astype(jnp.int32)      # label 0 reserved for background

    bt, lt = _pick_tiles(N, HW, M)
    grid = (N // bt, pl.cdiv(HW, lt))
    vmem_limit = int(min(max(_vmem_needed(bt, lt, M), 16 << 20), _VMEM_CAP_BYTES))

    out = pl.pallas_call(
        _watershed_masks_kernel,
        out_shape=jax.ShapeDtypeStruct((N, M, HW), jnp.bool_),
        grid=grid,
        in_specs=[
            pl.BlockSpec((1, lt), lambda nb, pb: (0, pb)),          # seed labels
            pl.BlockSpec((bt, 1, lt), lambda nb, pb: (nb, 0, pb)),  # image slab
        ],
        out_specs=pl.BlockSpec((bt, M, lt), lambda nb, pb: (nb, 0, pb)),
        compiler_params=pltpu.CompilerParams(
            dimension_semantics=("parallel", "parallel"),
            vmem_limit_bytes=vmem_limit),
    )(lab, x)

    return out.reshape(N, M, H, W)          # metadata-only reshape back to (N, M, H, W)


class MassMapsWatershed:
    """Drop-in style wrapper mirroring the nn.Module interface."""

    def __init__(self, compactness=0, normalize=False, seed_grid=(8, 8)):
        self.compactness = compactness
        self.normalize = normalize
        self.seed_grid = seed_grid

    def __call__(self, images):
        return mass_maps_watershed(images, compactness=self.compactness,
                                   normalize=self.normalize,
                                   seed_grid=self.seed_grid)

    forward = __call__


if __name__ == "__main__":
    key = jax.random.PRNGKey(0)
    N, C, H, W = 2, 1, 16, 16
    images = jax.random.uniform(key, (N, C, H, W), dtype=jnp.float32)

    model = MassMapsWatershed(compactness=0, normalize=False)
    out = jax.block_until_ready(model(images))

    M = 8 * 8 + 1
    assert out.shape == (N, M, H, W), out.shape
    assert out.dtype == jnp.bool_, out.dtype
    # Every pixel belongs to exactly one mask channel.
    assert bool(jnp.all(out.sum(axis=1) == 1))
    # Background channel (label 0) == pixels whose uint8 quantization is 0.
    fg_ref = (images[:, 0] * 255.0).astype(jnp.int32) != 0
    assert bool(jnp.all(out[:, 0] == ~fg_ref))

    print("KERNEL_OK")
</pallas_src>

<mosaic_0001>
module attributes {stable_mosaic.version = 11 : i64} {
  func.func @_watershed_masks_kernel(%arg0: i32, %arg1: i32, %arg2: memref<1x256xi32, #tpu.memory_space<vmem>>, %arg3: memref<1x1x256xf32, #tpu.memory_space<vmem>>, %arg4: memref<1x65x256xi32, #tpu.memory_space<vmem>>) attributes {dimension_semantics = [#tpu.dimension_semantics<parallel>, #tpu.dimension_semantics<parallel>], iteration_bounds = array<i64: 2, 1>, scalar_prefetch = 0 : i64, scratch_operands = 0 : i64, tpu.core_type = #tpu.core_type<tc>, window_params = [{transform_indices = @transform_0, window_bounds = array<i64: 1, 256>}, {transform_indices = @transform_1, window_bounds = array<i64: 1, 1, 256>}, {transform_indices = @transform_2, window_bounds = array<i64: 1, 65, 256>}]} {
    %c0 = arith.constant 0 : index
    %c0_0 = arith.constant 0 : index
    %c0_1 = arith.constant 0 : index
    %0 = vector.load %arg3[%c0, %c0_0, %c0_1] : memref<1x1x256xf32, #tpu.memory_space<vmem>>, vector<1x1x256xf32>
    %1 = vector.shape_cast %0 : vector<1x1x256xf32> to vector<1x256xf32>
    %2 = math.absf %1 : vector<1x256xf32>
    %cst = arith.constant 2.550000e+02 : f32
    %3 = vector.broadcast %cst : f32 to vector<1x256xf32>
    %4 = arith.mulf %2, %3 : vector<1x256xf32>
    %cst_2 = arith.constant 1.000000e+00 : f32
    %5 = vector.broadcast %cst_2 : f32 to vector<1x256xf32>
    %6 = arith.cmpf oge, %4, %5 : vector<1x256xf32>
    %c0_3 = arith.constant 0 : index
    %c0_4 = arith.constant 0 : index
    %7 = vector.load %arg2[%c0_3, %c0_4] : memref<1x256xi32, #tpu.memory_space<vmem>>, vector<1x256xi32>
    %c0_i32 = arith.constant 0 : i32
    %8 = vector.broadcast %c0_i32 : i32 to vector<1x256xi32>
    %9 = arith.select %6, %7, %8 : vector<1x256xi1>, vector<1x256xi32>
    %10 = tpu.iota {dimensions = array<i32: 0>} : vector<65x1xi32>
    %11 = vector.shape_cast %9 : vector<1x256xi32> to vector<1x1x256xi32>
    %12 = vector.shape_cast %10 : vector<65x1xi32> to vector<1x65x1xi32>
    %13 = vector.broadcast %11 : vector<1x1x256xi32> to vector<1x65x256xi32>
    %14 = vector.broadcast %12 : vector<1x65x1xi32> to vector<1x65x256xi32>
    %15 = arith.cmpi eq, %13, %14 : vector<1x65x256xi32>
    %c0_5 = arith.constant 0 : index
    %c0_6 = arith.constant 0 : index
    %c0_7 = arith.constant 0 : index
    %16 = vector.load %arg4[%c0_5, %c0_6, %c0_7] : memref<1x65x256xi32, #tpu.memory_space<vmem>>, vector<1x65x256xi32>
    %17 = arith.extui %15 : vector<1x65x256xi1> to vector<1x65x256xi32>
    %cst_8 = arith.constant dense<0> : vector<1x65x256xi32>
    %18 = arith.cmpi ne, %16, %cst_8 : vector<1x65x256xi32>
    tpu.vector_store %arg4[%c0_5, %c0_6, %c0_7], %17 {strides = array<i32>} : memref<1x65x256xi32, #tpu.memory_space<vmem>>, vector<1x65x256xi32>,
    return
  }
  func.func @transform_0(%arg0: i32, %arg1: i32) -> (i32, i32) {
    %c0_i32 = arith.constant 0 : i32
    %c0_i32_0 = arith.constant 0 : i32
    return %c0_i32, %arg1 : i32, i32
  }
  func.func @transform_1(%arg0: i32, %arg1: i32) -> (i32, i32, i32) {
    %c0_i32 = arith.constant 0 : i32
    %c0_i32_0 = arith.constant 0 : i32
    return %arg0, %c0_i32, %arg1 : i32, i32, i32
  }
  func.func @transform_2(%arg0: i32, %arg1: i32) -> (i32, i32, i32) {
    %c0_i32 = arith.constant 0 : i32
    %c0_i32_0 = arith.constant 0 : i32
    return %arg0, %c0_i32, %arg1 : i32, i32, i32
  }
}

</mosaic_0001>

<bundles_post_ra>
// kernel: tpu_custom_call.1
= control target key start
LH: loop header
LB: loop body
LE: loop exit
PB: predicated region body
PF: predicated region fallthrough
CT: control target
= control target key end

     0   :  { %7 = vsyncpa [#allocation3], 0  ;;  %s797_s0 = inlined_call_operand.hbm [shape: s32[1,256], index: 0, kind: input, shape index: {}]   ;;  %s798_s1 = inlined_call_operand.hbm [shape: f32[2,1,256], index: 1, kind: input, shape index: {}]   ;;  %s799_s2 = inlined_call_operand.vmem [shape: s32[2,65,256], index: 2, kind: output, shape index: {}]  }
   0x1   :  { %8 = vsyncpa [#allocation5], 0 }
   0x2   :  { %10 = vsyncpa [#allocation5 + $0x1], 0  ;;  %s614_s9 = smov 0   ;;  %s616_s10 = smov 0  }
   0x3   :  { %s618_s11 = smov 0   ;;  %s620_s12 = smov 0  }
   0x4   :  { %s622_s13 = smov 0   ;;  %s624_s14 = smov 0  }
   0x5 LB: > { %s399_s15 = sadd.s32 4294967295, %s594_s14   ;;  %p76_p0 = scmp.ne.s32.totalorder %s578_s10, %s574_s9  ;;  %s594_s14 = sphi %s624_s14, %s16_s14   ;;  %s590_s13 = sphi %s622_s13, %s818_s13   ;;  %s586_s12 = sphi %s620_s12, %s817_s12   ;;  %s582_s11 = sphi %s618_s11, %s816_s11   ;;  %s578_s10 = sphi %s616_s10, %s815_s10   ;;  %s574_s9 = sphi %s614_s9, %s814_s9  }
   0x6   : > { %p644_p1 = scmp.eq.s32.totalorder %s399_s15, 0  ;;  %p401_p2 = scmp.ge.s32.totalorder %s594_s14, 1 }
   0x7   : > { %p115_p3 = scmp.lt.s32.totalorder %s594_s14, 3  ;;  %s596_s19 = smov [#allocation2]  }
   0x8   : > { %s804_s16 = scalar_select %p644_p1, 1, 0 }
   0x9   : > { %p652_p4 = por %p644_p1, %p76_p0  ;;  %p656_p5 = pnand %p401_p2, %p115_p3 }
   0xa   : > { %s131_s20 = sshll.u32 %s596_s19, 4  ;;  %s28_s22 = sadd.s32 1, %s590_s13  ;;  %s132_s20 = int_to_ptr.vmem [resolvable:$true] %s131_s20 }
   0xb   : > { %s805_s17 = scalar_select %p652_p4, 1, 0 }
   0xc   : > { %s806_s18 = scalar_select %p656_p5, 1, 0 }
   0xd   : > { %p421_p6 = pneg %p656_p5  ;;  %s63_s23 = sadd.s32 1, %s582_s11 }
   0xe   : > { %p670_p8 = scmp.ge.s32.totalorder %s28_s22, 2  ;;  %s482_s27 = scalar_lea.hbm %s797_s0, 32 }
   0xf   : > { %p664_p7 = pnand %p421_p6, %p644_p1  ;;  %p483_p9 = scmp.ne.s32.totalorder %s797_s0, %s482_s27 }
  0x10   : > { %s808_s24 = scalar_select %p670_p8, 1, 0 }
  0x11   : > { %p484_p10 = pneg %p664_p7  ;;  %p489_p13 = scmp.lt.u32.totalorder %s482_s27, %s797_s0 }
  0x13   : > { %p485_p11 = pnand %p484_p10, %p483_p9 }
  0x15   : > { %p486_p12 = pneg %p485_p11 }
  0x17   : > { %p491_p0 = pnand %p489_p13, %p486_p12 }
  0x19   : > { %494 = shalt.err (!%p491_p0)
}
  0x1a   : > { %s495_s4 = scalar_lea.vmem %s132_s20, 32  ;;  %p503_p4 = scmp.lt.s32.totalorder %s132_s20, %s132_s20 }
  0x1b   : > { %p496_p2 = scmp.ne.s32.totalorder %s132_s20, %s495_s4  ;;  %p504_p1 = scmp.lt.s32.totalorder %s495_s4, %s495_s4 }
  0x1d   : > { %p498_p3 = pnand %p496_p2, %p484_p10  ;;  %p505_p5 = por %p504_p1, %p503_p4 }
  0x1f   : > { %p499_p6 = pneg %p498_p3 }
  0x21   : > { %p506_p8 = pnand %p505_p5, %p499_p6 }
  0x23   : > { %509 = shalt.err (!%p506_p8)
}
  0x24   : > { %424 = dma.hbm_to_vmem [thread:$0]  (!%p664_p7), %s797_s0, 32, %s132_s20, [#allocation3]  }
  0x25   : > { %p809_p9 = scmp.ne.s32.totalorder %s808_s24, 0  ;;  %p70_p1 = scmp.ne.s32.totalorder %s582_s11, %s578_s10 }
  0x26   : > { %p71_p4 = scmp.eq.s32.totalorder %s594_s14, 0  ;;  %p430_p5 = scmp.lt.s32.totalorder %s594_s14, 2 }
  0x27   : > { %s820_s22 = smov (%p809_p9, %s28_s22), 0  ;;  %s142_s8 = sand.u32 1, %s582_s11  }
  0x28   : > { %s58_s7 = ssub.s32 %s590_s13, %s820_s22  ;;  %p72_p10 = por %p71_p4, %p70_p1 }
  0x29   : > { %p61_p8 = scmp.eq.s32.totalorder %s58_s7, 0  ;;  %s413_s9 = sshll.u32 %s590_s13, 5 }
  0x2a   : > { %s404_s19 = sshll.u32 %s142_s8, 1  ;;  %s710_s20 = scalar_lea.hbm %s798_s1, %s413_s9 }
  0x2b   : > { %s705_s15 = scalar_select %p61_p8, %s582_s11, %s63_s23  }
  0x2c   : > { %s146_s24 = scalar_lea.vmem [#allocation4], %s404_s19  ;;  %p712_p7 = pnand %p430_p5, %p72_p10 }
  0x2d   : > { %s156_s26 = sshll.u32 %s146_s24, 4  ;;  %s143_s23 = scalar_lea.sflag [#allocation5], %s142_s8  ;;  %s716_s26 = int_to_ptr.vmem [resolvable:$true] %s156_s26 }
  0x2e   : > { %s510_s28 = scalar_lea.hbm %s710_s20, 32  ;;  %p512_p12 = pneg %p712_p7 }
  0x2f   : > { %p511_p11 = scmp.ne.s32.totalorder %s710_s20, %s510_s28  ;;  %s515_s3 = scalar_lea.hbm %s798_s1, 64 }
  0x30   : > { %p516_p2 = scmp.lt.u32.totalorder %s710_s20, %s798_s1  ;;  %p517_p3 = scmp.lt.u32.totalorder %s515_s3, %s510_s28 }
  0x31   : > { %p513_p13 = pnand %p512_p12, %p511_p11  ;;  %p519_p9 = scmp.lt.u32.totalorder %s510_s28, %s710_s20 }
  0x32   : > { %p518_p6 = por %p517_p3, %p516_p2 }
  0x33   : > { %p514_p0 = pneg %p513_p13 }
  0x34   : > { %p520_p1 = por %p519_p9, %p518_p6 }
  0x36   : > { %p521_p4 = pnand %p520_p1, %p514_p0 }
  0x38   : > { %524 = shalt.err (!%p521_p4)
}
  0x39   : > { %s525_s6 = scalar_lea.vmem %s716_s26, 32  ;;  %s597_s7 = smov [#allocation4]  }
  0x3a   : > { %p526_p5 = scmp.ne.s32.totalorder %s716_s26, %s525_s6  ;;  %s530_s8 = sshll.u32 %s597_s7, 4  ;;  %s531_s8 = int_to_ptr.vmem [resolvable:$false] %s530_s8 }
  0x3b   : > { %s532_s9 = scalar_lea.vmem %s531_s8, 64  ;;  %p533_p11 = scmp.lt.s32.totalorder %s716_s26, %s531_s8 }
  0x3c   : > { %p528_p8 = pnand %p526_p5, %p512_p12  ;;  %p534_p13 = scmp.lt.s32.totalorder %s532_s9, %s525_s6 }
  0x3e   : > { %p529_p10 = pneg %p528_p8  ;;  %p535_p2 = por %p534_p13, %p533_p11 }
  0x40   : > { %p536_p3 = pnand %p535_p2, %p529_p10 }
  0x42   : > { %539 = shalt.err (!%p536_p3)
}
  0x43   : > { %428 = dma.hbm_to_vmem [thread:$0]  (!%p712_p7), %s710_s20, 32, %s716_s26, %s143_s23  }
  0x44   : > { %p811_p0 = scmp.ne.s32.totalorder %s806_s18, 0 }
  0x45   : > { %p812_p12 = scmp.ne.s32.totalorder (!%p811_p0), %s804_s16, 0 }
  0x46   : > { %165 = sbr.rel (%p811_p0) target bundleno = 102 (0x66), region = 28 }
  0x4d   : > { %565 = dma.done.wait (%p812_p12), [#allocation3], 32  }
  0x4e   : > { %567 = vsyncadd (%p812_p12), [#allocation3], 4294967264  ;;  %s171_s19 = sand.u32 1, %s578_s10   ;;  %p813_p6 = scmp.ne.s32.totalorder %s805_s17, 0 }
  0x4f   : > { %s409_s21 = sshll.u32 %s171_s19, 1  ;;  %s172_s25 = scalar_lea.sflag [#allocation5], %s171_s19 }
  0x50   : > { %s175_s24 = scalar_lea.vmem [#allocation4], %s409_s21 }
  0x51   : > { %569 = dma.done.wait (%p813_p6), %s172_s25, 32  }
  0x52   : > { %571 = vsyncadd (%p813_p6), %s172_s25, 4294967264  ;;  %v218_v0 = vlaneseq  ;;  %p203_p7 = scmp.lt.s32.totalorder %s586_s12, 1  ;;  %v212_v2 = vld [vmem:[%s175_s24] sm:$0x3]  ;;  %v216_v5 = vld [vmem:[#allocation2] sm:$0x3] }
  0x53   : > { %v213_v3 = vand.u32 2147483647, %v212_v2  ;;  %v598_v19 = vmov 0  }
  0x54   : > { %v219_v1 = vshrl.u32 %v218_v0, 7  ;;  %s822_s12 = smov (!%p203_p7, %s586_s12), 1 }
  0x55   : > { %v214_v4 = vmul.f32 255.0, %v213_v3  ;;  %s414_s16 = smul.u32 144, %s822_s12 }
  0x56   : > { %v230_v6 = vsub.s32 0, %v219_v1  ;;  %v234_v7 = vsub.s32 1, %v219_v1  ;;  %v220_v8 = vadd.s32 8, %v219_v1  ;;  %v221_v10 = vadd.s32 16, %v219_v1 }
  0x57   : > { %vm215_vm0 = vcmp.ge.f32.partialorder %v214_v4, 1.0  ;;  %v222_v13 = vadd.s32 24, %v219_v1  ;;  %v223_v14 = vadd.s32 32, %v219_v1  ;;  %s759_s20 = scalar_lea.vmem %s799_s2, %s414_s16  ;;  %v224_v15 = vadd.s32 40, %v219_v1 }
  0x58   : > { %v217_v9 = vsel %vm215_vm0, %v216_v5, 0  ;;  %v225_v16 = vadd.s32 48, %v219_v1  ;;  %v226_v17 = vadd.s32 56, %v219_v1  ;;  %v227_v18 = vadd.s32 64, %v219_v1 }
  0x59   : > { %v231_v11 = vrot.slane %v217_v9, %v230_v6  ;;  %v235_v12 = vrot.slane %v217_v9, %v234_v7 }
  0x5b   : > { %vm236_vm1 = vcmp.eq.s32.totalorder %v231_v11, %v219_v1  ;;  %vm237_vm2 = vcmp.eq.s32.totalorder %v235_v12, %v219_v1  ;;  %vm238_vm3 = vcmp.eq.s32.totalorder %v231_v11, %v220_v8  ;;  %vm239_vm4 = vcmp.eq.s32.totalorder %v235_v12, %v220_v8 }
  0x5c   : > { %v254_v20 = vsel %vm236_vm1, 1, %v598_v19  ;;  %v255_v21 = vsel %vm237_vm2, 1, %v598_v19  ;;  %v256_v22 = vsel %vm238_vm3, 1, %v598_v19  ;;  %v257_v23 = vsel %vm239_vm4, 1, %v598_v19 }
  0x5d   : > { %272 = vst [vmem:[%s759_s20] sm:$0xff] %v254_v20  ;;  %273 = vst [vmem:[%s759_s20 + $0x8] sm:$0xff] %v255_v21  ;;  %vm240_vm5 = vcmp.eq.s32.totalorder %v231_v11, %v221_v10  ;;  %vm241_vm6 = vcmp.eq.s32.totalorder %v235_v12, %v221_v10  ;;  %vm242_vm7 = vcmp.eq.s32.totalorder %v231_v11, %v222_v13 }
  0x5e   : > { %274 = vst [vmem:[%s759_s20 + $0x10] sm:$0xff] %v256_v22  ;;  %275 = vst [vmem:[%s759_s20 + $0x18] sm:$0xff] %v257_v23  ;;  %vm243_vm8 = vcmp.eq.s32.totalorder %v235_v12, %v222_v13  ;;  %v258_v24 = vsel %vm240_vm5, 1, %v598_v19  ;;  %v259_v25 = vsel %vm241_vm6, 1, %v598_v19  ;;  %v260_v26 = vsel %vm242_vm7, 1, %v598_v19 }
  0x5f   : > { %v261_v27 = vsel %vm243_vm8, 1, %v598_v19  ;;  %276 = vst [vmem:[%s759_s20 + $0x20] sm:$0xff] %v258_v24  ;;  %277 = vst [vmem:[%s759_s20 + $0x28] sm:$0xff] %v259_v25  ;;  %vm244_vm9 = vcmp.eq.s32.totalorder %v231_v11, %v223_v14  ;;  %vm245_vm10 = vcmp.eq.s32.totalorder %v235_v12, %v223_v14  ;;  %vm246_vm11 = vcmp.eq.s32.totalorder %v231_v11, %v224_v15 }
  0x60   : > { %278 = vst [vmem:[%s759_s20 + $0x30] sm:$0xff] %v260_v26  ;;  %279 = vst [vmem:[%s759_s20 + $0x38] sm:$0xff] %v261_v27  ;;  %vm247_vm12 = vcmp.eq.s32.totalorder %v235_v12, %v224_v15  ;;  %v262_v28 = vsel %vm244_vm9, 1, %v598_v19  ;;  %v263_v29 = vsel %vm245_vm10, 1, %v598_v19  ;;  %v264_v30 = vsel %vm246_vm11, 1, %v598_v19 }
  0x61   : > { %v265_v31 = vsel %vm247_vm12, 1, %v598_v19  ;;  %280 = vst [vmem:[%s759_s20 + $0x40] sm:$0xff] %v262_v28  ;;  %281 = vst [vmem:[%s759_s20 + $0x48] sm:$0xff] %v263_v29  ;;  %vm248_vm13 = vcmp.eq.s32.totalorder %v231_v11, %v225_v16  ;;  %vm249_vm14 = vcmp.eq.s32.totalorder %v235_v12, %v225_v16  ;;  %vm250_vm15 = vcmp.eq.s32.totalorder %v231_v11, %v226_v17 }
  0x62   : > { %282 = vst [vmem:[%s759_s20 + $0x50] sm:$0xff] %v264_v30  ;;  %283 = vst [vmem:[%s759_s20 + $0x58] sm:$0xff] %v265_v31  ;;  %vm251_vm0 = vcmp.eq.s32.totalorder %v235_v12, %v226_v17  ;;  %v266_v32 = vsel %vm248_vm13, 1, %v598_v19  ;;  %v267_v33 = vsel %vm249_vm14, 1, %v598_v19  ;;  %v268_v34 = vsel %vm250_vm15, 1, %v598_v19 }
  0x63   : > { %v269_v35 = vsel %vm251_vm0, 1, %v598_v19  ;;  %284 = vst [vmem:[%s759_s20 + $0x60] sm:$0xff] %v266_v32  ;;  %285 = vst [vmem:[%s759_s20 + $0x68] sm:$0xff] %v267_v33  ;;  %vm252_vm1 = vcmp.eq.s32.totalorder %v231_v11, %v227_v18  ;;  %vm253_vm2 = vcmp.eq.s32.totalorder %v235_v12, %v227_v18 }
  0x64   : > { %286 = vst [vmem:[%s759_s20 + $0x70] sm:$0xff] %v268_v34  ;;  %287 = vst [vmem:[%s759_s20 + $0x78] sm:$0xff] %v269_v35  ;;  %v270_v36 = vsel %vm252_vm1, 1, %v598_v19  ;;  %v271_v37 = vsel %vm253_vm2, 1, %v598_v19 }
  0x65   : > { %288 = vst [vmem:[%s759_s20 + $0x80] sm:$0x1] %v270_v36  ;;  %289 = vst [vmem:[%s759_s20 + $0x88] sm:$0x1] %v271_v37 }
  0x66 PF: > { %s16_s14 = sadd.s32 1, %s594_s14   ;;  %s814_s9 = smov %s578_s10 }
  0x67   : > { %p13_p9 = scmp.ge.s32.totalorder %s16_s14, 4   ;;  %s815_s10 = smov %s582_s11 }
  0x68   : > { %s816_s11 = smov %s705_s15  ;;  %s817_s12 = smov %s590_s13 }
  0x69   : > { %s818_s13 = smov %s820_s22  ;;  %15 = sbr.rel (!%p13_p9) target bundleno = 5 (0x5), region = 74 }
  0x70   :  { %320 = vsyncpa [#allocation3], 1 }
  0x71   :  { %322 = vsyncpa [#allocation3 + $0x1], 1 }
  0x72   :  { %323 = vsyncpa [#allocation5], 1 }
  0x73   :  { %325 = vsyncpa [#allocation5 + $0x1], 1 }

</bundles_post_ra>
